<compile_context>
chip_gen: v7x
topology: tpu7x:2x2x1
jax: 0.10.0
libtpu: 0.0.40
codegen_flags: <defaults>
</compile_context>

<pallas_src>
import functools

import numpy as np
import jax
import jax.numpy as jnp
from jax import lax
from jax.experimental import pallas as pl
from jax.experimental.pallas import tpu as pltpu

_NEG_BIG = -1e30   # "minus infinity" that never produces NaN in the online LSE


def _round_up(x, m):
    return ((x + m - 1) // m) * m


def _pad_to(x, shape, value=0):
    """Zero/value-pad `x` up to `shape`; no-op (no copy) when already aligned."""
    pads = [(0, t - s) for s, t in zip(x.shape, shape)]
    if all(p == (0, 0) for p in pads):
        return x
    return jnp.pad(x, pads, constant_values=value)


def _chip_defaults():
    """Return (block_rows, block_cols, vmem_limit_bytes, force_two_row_blocks)."""
    vmem_bytes = None
    try:
        info = pltpu.get_tpu_info()
        vmem_bytes = getattr(info, "vmem_capacity_bytes", None)
    except Exception:
        vmem_bytes = None
    if vmem_bytes is None:
        vmem_bytes = 64 * 1024 * 1024              # conservative (v7x-sized)
    if vmem_bytes >= 100 * 1024 * 1024:            # v5e / v6e: 128 MiB VMEM
        # cf is re-streamed from HBM once per row block: bigger row blocks
        # directly cut the dominant HBM traffic on the low-bandwidth parts.
        return 512, 512, 64 * 1024 * 1024, False
    # v7x: only 64 MiB VMEM per TC, but 3.2 TB/s HBM and 2 TensorCores ->
    # smaller resident blocks, keep >= 2 row blocks so the "parallel" grid
    # axis can shard across both cores.
    return 256, 512, 32 * 1024 * 1024, True


def _supcon_kernel(*refs, loss_scale, block_rows, block_cols, n_contrast,
                   has_mask, needs_col_mask):
    if has_mask:
        (af_ref, cf_ref, pmask_ref, cnt_ref,
         out_ref, m_ref, l_ref, acc_ref) = refs
    else:
        (af_ref, cf_ref, alab_ref, clab_ref, cnt_ref,
         out_ref, m_ref, l_ref, acc_ref) = refs

    i = pl.program_id(0)            # anchor-row block   (parallel)
    k = pl.program_id(1)            # contrast-col block (reduction, last axis)
    nk = pl.num_programs(1)

    @pl.when(k == 0)
    def _init():
        m_ref[...] = jnp.full(m_ref.shape, -jnp.inf, dtype=m_ref.dtype)
        l_ref[...] = jnp.zeros(l_ref.shape, l_ref.dtype)
        acc_ref[...] = jnp.zeros(acc_ref.shape, acc_ref.dtype)

    # 1/temperature was folded into the anchor features in the wrapper's
    # pad/cast pass, so the MXU operands are consumed as-is (bf16 by default),
    # with f32 accumulation.  Feature dims contracted directly (no transpose).
    s = lax.dot_general(af_ref[...], cf_ref[...], (((1,), (1,)), ((), ())),
                        preferred_element_type=jnp.float32)     # [TM, TK] f32

    # Positive-weighted logits: one fused select (labels) or one multiply
    # (explicit mask; its diagonal was zeroed host-side).
    if has_mask:
        pos_s = pmask_ref[...].astype(jnp.float32) * s
    else:
        eq = alab_ref[...] == clab_ref[...]                      # [TM, TK]
        pos_s = jnp.where(eq, s, 0.0)

    def _commit(s_eff, pos_eff):
        # Online (flash-style) log-sum-exp over contrast columns.
        m_prev = m_ref[...]                                      # [TM, 1]
        m_curr = jnp.maximum(m_prev, jnp.max(s_eff, axis=1, keepdims=True))
        alpha = jnp.exp(m_prev - m_curr)
        e = jnp.exp(s_eff - m_curr)                              # masked -> 0
        l_ref[...] = l_ref[...] * alpha + jnp.sum(e, axis=1, keepdims=True)
        acc_ref[...] = acc_ref[...] + jnp.sum(pos_eff, axis=1, keepdims=True)
        m_ref[...] = m_curr

    row0 = i * block_rows
    col0 = k * block_cols
    has_diag = jnp.logical_and(row0 < col0 + block_cols,
                               col0 < row0 + block_rows)
    if needs_col_mask:
        # Only the last column block can contain padded columns.
        needs_fix = jnp.logical_or(has_diag, k == nk - 1)
    else:
        needs_fix = has_diag

    @pl.when(needs_fix)
    def _masked_tile():
        # Exclude the self-similarity diagonal (and padded columns) from the
        # denominator / running max with a single select on s itself.
        rr = lax.broadcasted_iota(jnp.int32, (block_rows, block_cols), 0) \
            + (row0 - col0)
        cc = lax.broadcasted_iota(jnp.int32, (block_rows, block_cols), 1)
        not_diag = rr != cc
        ok = not_diag
        if needs_col_mask:
            ok = jnp.logical_and(ok, (cc + col0) < n_contrast)
        s_eff = jnp.where(ok, s, _NEG_BIG)
        if has_mask:
            pos_eff = pos_s            # diag already zeroed in the streamed mask
        else:
            pos_eff = jnp.where(not_diag, pos_s, 0.0)
        _commit(s_eff, pos_eff)

    @pl.when(jnp.logical_not(needs_fix))
    def _clean_tile():
        _commit(s, pos_s)

    @pl.when(k == nk - 1)
    def _finalize():
        # mean_log_prob_pos = sum(pos * logits)/count - m - log(l)
        #   (= acc/cnt - log(sum_{valid, non-diag} exp(logits)); the row-max
        #    subtraction of the PyTorch code cancels exactly).
        # NOTE: like the PyTorch original, an anchor with zero positives
        # yields NaN (0/0) -- kept for semantic parity.
        mean_pos = acc_ref[...] / cnt_ref[...]          # exact, once per block
        out_ref[...] = (-loss_scale) * (mean_pos - m_ref[...]
                                        - jnp.log(l_ref[...]))


def supcon_loss(features, labels=None, mask=None, *,
                temperature=0.07, contrast_mode="all", base_temperature=0.07,
                block_rows=None, block_cols=None, matmul_dtype=jnp.bfloat16):
    """JAX/Pallas equivalent of SupConLoss.forward (forward pass only)."""
    if features.ndim < 3:
        raise ValueError("`features` needs to be [bsz, n_views, ...], "
                         "at least 3 dimensions are required")
    if features.ndim > 3:
        features = features.reshape(features.shape[0], features.shape[1], -1)
    if labels is not None and mask is not None:
        raise ValueError("Cannot define both `labels` and `mask`")
    if contrast_mode not in ("all", "one"):
        raise ValueError("Unknown mode: {}".format(contrast_mode))

    bsz, n_views, dim = features.shape
    n_contrast = bsz * n_views
    inv_temp = float(1.0 / temperature)
    loss_scale = float(temperature / base_temperature)
    store_dtype = np.dtype(matmul_dtype)

    # contrast_feature = cat(unbind(features, dim=1), dim=0): row r is view
    # r // bsz of sample r % bsz.
    cf = jnp.transpose(features, (1, 0, 2)).reshape(n_contrast, dim)
    cf = cf.astype(jnp.float32)
    if contrast_mode == "one":
        n_anchor, anchor_count = bsz, 1
    else:
        n_anchor, anchor_count = n_contrast, n_views

    has_mask = mask is not None

    # ---- positive structure (tiny O(N) metadata; no N x N mask in HBM for
    #      the labels / SimCLR paths) --------------------------------------
    if not has_mask:
        if labels is not None:
            labels = jnp.asarray(labels).reshape(-1).astype(jnp.int32)
            if labels.shape[0] != bsz:
                raise ValueError("Num of labels does not match num of features")
            labels = labels - jnp.min(labels)        # >= 0; -1 marks padding
        else:
            labels = jnp.arange(bsz, dtype=jnp.int32)   # SimCLR: eye(bsz)
        vlab = jnp.tile(labels, n_views)
        alab = vlab[:n_anchor]
        # positives per anchor = n_views * (#same-label samples) - 1 (self)
        same = jnp.sum((labels[:, None] == labels[None, :]).astype(jnp.float32),
                       axis=1)
        pos_count = jnp.tile(same * float(n_views) - 1.0, n_views)[:n_anchor]
    else:
        base_mask = jnp.asarray(mask).astype(jnp.float32)
        tiled = jnp.tile(base_mask, (anchor_count, n_views))       # [Na, Nc]
        idx = jnp.arange(n_anchor)
        tiled = tiled.at[idx, idx].set(0.0)          # logits_mask folded in
        pos_count = jnp.sum(tiled, axis=1)

    # ---- tile sizes / padding --------------------------------------------
    def_rows, def_cols, vmem_limit, two_row_blocks = _chip_defaults()
    auto_rows = block_rows is None
    br = def_rows if block_rows is None else block_rows
    bc = def_cols if block_cols is None else block_cols

    tm = min(_round_up(br, 8), _round_up(n_anchor, 8))
    if auto_rows and two_row_blocks and n_anchor > 8:
        # keep >= 2 row blocks so megacore sharding has work on both TCs
        tm = min(tm, max(8, _round_up(-(-n_anchor // 2), 8)))
    tk = min(_round_up(bc, 128), _round_up(n_contrast, 128))
    nr = _round_up(n_anchor, tm)
    nc = _round_up(n_contrast, tk)
    dpad = _round_up(dim, 128)                        # lane density / MXU K

    # Single pad/cast pass; 1/temperature folded into the small anchor operand
    # here instead of per-k inside the kernel.  Pads are skipped when aligned.
    af_p = _pad_to((cf[:n_anchor] * inv_temp).astype(store_dtype), (nr, dpad))
    cf_p = _pad_to(cf.astype(store_dtype), (nc, dpad))
    cnt_p = _pad_to(pos_count.reshape(-1, 1).astype(jnp.float32), (nr, 1),
                    value=1.0)                        # pad rows: avoid 0/0

    inputs = [af_p, cf_p]
    in_specs = [
        pl.BlockSpec((tm, dpad), lambda i, k: (i, 0)),    # anchor rows (resident)
        pl.BlockSpec((tk, dpad), lambda i, k: (k, 0)),    # contrast rows
    ]
    if has_mask:
        # Arbitrary (possibly asymmetric) user mask: stream it tiled in bf16
        # (only this rarely-used path pays the O(N^2) mask bandwidth).
        pmask_p = _pad_to(tiled.astype(jnp.bfloat16), (nr, nc))
        inputs.append(pmask_p)
        in_specs.append(pl.BlockSpec((tm, tk), lambda i, k: (i, k)))
    else:
        alab_p = _pad_to(alab.reshape(-1, 1), (nr, 1), value=-1)
        clab_p = _pad_to(vlab.reshape(1, -1), (1, nc), value=-1)
        inputs.extend([alab_p, clab_p])
        in_specs.extend([
            pl.BlockSpec((tm, 1), lambda i, k: (i, 0)),   # anchor labels
            pl.BlockSpec((1, tk), lambda i, k: (0, k)),   # contrast labels
        ])
    inputs.append(cnt_p)
    in_specs.append(pl.BlockSpec((tm, 1), lambda i, k: (i, 0)))  # pos counts

    kernel = functools.partial(
        _supcon_kernel,
        loss_scale=loss_scale,
        block_rows=tm, block_cols=tk,
        n_contrast=n_contrast,
        has_mask=has_mask,
        needs_col_mask=(nc != n_contrast),
    )

    out = pl.pallas_call(
        kernel,
        out_shape=jax.ShapeDtypeStruct((nr, 1), jnp.float32),
        grid_spec=pltpu.PrefetchScalarGridSpec(
            num_scalar_prefetch=0,
            grid=(nr // tm, nc // tk),
            in_specs=in_specs,
            out_specs=pl.BlockSpec((tm, 1), lambda i, k: (i, 0)),
            scratch_shapes=[pltpu.VMEM((tm, 1), jnp.float32)
                            for _ in range(3)],     # m, l, acc
        ),
        compiler_params=pltpu.CompilerParams(
            dimension_semantics=("parallel", "arbitrary"),
            vmem_limit_bytes=vmem_limit,
        ),
    )(*inputs)

    # loss.view(anchor_count, batch_size).mean() == mean over all real anchors.
    per_anchor = out[:n_anchor, 0]
    return jnp.mean(per_anchor)


def _supcon_loss_ref(features, labels=None, mask=None, *, temperature=0.07,
                     contrast_mode="all", base_temperature=0.07):
    """Pure-JAX reference mirroring the PyTorch module."""
    if features.ndim > 3:
        features = features.reshape(features.shape[0], features.shape[1], -1)
    bsz, n_views, _ = features.shape
    if labels is None and mask is None:
        base_mask = jnp.eye(bsz, dtype=jnp.float32)
    elif labels is not None:
        labels = jnp.asarray(labels).reshape(-1, 1)
        base_mask = (labels == labels.T).astype(jnp.float32)
    else:
        base_mask = jnp.asarray(mask).astype(jnp.float32)
    cf = jnp.transpose(features, (1, 0, 2)).reshape(n_views * bsz, -1)
    cf = cf.astype(jnp.float32)
    if contrast_mode == "one":
        af, anchor_count = cf[:bsz], 1
    else:
        af, anchor_count = cf, n_views
    logits = jnp.matmul(af, cf.T, precision=lax.Precision.HIGHEST) / temperature
    logits = logits - jnp.max(logits, axis=1, keepdims=True)
    n_a = anchor_count * bsz
    pos = jnp.tile(base_mask, (anchor_count, n_views))
    lm = jnp.ones_like(pos).at[jnp.arange(n_a), jnp.arange(n_a)].set(0.0)
    pos = pos * lm
    exp_logits = jnp.exp(logits) * lm
    log_prob = logits - jnp.log(exp_logits.sum(1, keepdims=True))
    mean_log_prob_pos = (pos * log_prob).sum(1) / pos.sum(1)
    loss = -(temperature / base_temperature) * mean_log_prob_pos
    return loss.reshape(anchor_count, bsz).mean()


if __name__ == "__main__":
    key = jax.random.PRNGKey(0)
    k1, k2, k3, k4 = jax.random.split(key, 4)

    bsz, n_views, dim = 4, 2, 32
    features = jax.random.normal(k1, (bsz, n_views, dim), dtype=jnp.float32)
    features = features / jnp.linalg.norm(features, axis=-1, keepdims=True)
    labels = jnp.array([0, 1, 0, 1], dtype=jnp.int32)

    # 1) supervised, default bf16 MXU fast path (loose tolerance for bf16 operands)
    loss_bf16 = jax.block_until_ready(supcon_loss(features, labels=labels))
    ref = _supcon_loss_ref(features, labels=labels)
    assert jnp.allclose(loss_bf16, ref, rtol=5e-2, atol=5e-2), (loss_bf16, ref)

    # 2) supervised, exact f32 MXU path
    loss_f32 = jax.block_until_ready(
        supcon_loss(features, labels=labels, matmul_dtype=jnp.float32))
    assert jnp.allclose(loss_f32, ref, rtol=2e-3, atol=2e-3), (loss_f32, ref)

    # 3) SimCLR degenerate case (no labels, no mask)
    loss_simclr = jax.block_until_ready(
        supcon_loss(features, matmul_dtype=jnp.float32))
    ref_simclr = _supcon_loss_ref(features)
    assert jnp.allclose(loss_simclr, ref_simclr, rtol=2e-3, atol=2e-3)

    # 4) explicit (possibly asymmetric) mask path
    user_mask = (jax.random.uniform(k2, (bsz, bsz)) > 0.5).astype(jnp.float32)
    user_mask = jnp.maximum(user_mask, jnp.eye(bsz, dtype=jnp.float32))
    loss_mask = jax.block_until_ready(
        supcon_loss(features, mask=user_mask, matmul_dtype=jnp.float32))
    ref_mask = _supcon_loss_ref(features, mask=user_mask)
    assert jnp.allclose(loss_mask, ref_mask, rtol=2e-3, atol=2e-3)

    # 5) contrast_mode='one'
    loss_one = jax.block_until_ready(
        supcon_loss(features, labels=labels, contrast_mode="one",
                    matmul_dtype=jnp.float32))
    ref_one = _supcon_loss_ref(features, labels=labels, contrast_mode="one")
    assert jnp.allclose(loss_one, ref_one, rtol=2e-3, atol=2e-3)

    # 6) multi-tile exercise: several row blocks, 2 column blocks, row/column
    #    padding, diagonal and off-diagonal tiles, online reduction.
    bsz2, n_views2 = 80, 2
    feats2 = jax.random.normal(k3, (bsz2, n_views2, dim), dtype=jnp.float32)
    feats2 = feats2 / jnp.linalg.norm(feats2, axis=-1, keepdims=True)
    labels2 = jax.random.randint(k4, (bsz2,), 0, 4, dtype=jnp.int32)
    loss_multi = jax.block_until_ready(
        supcon_loss(feats2, labels=labels2, block_rows=64, block_cols=128,
                    matmul_dtype=jnp.float32))
    ref_multi = _supcon_loss_ref(feats2, labels=labels2)
    assert jnp.allclose(loss_multi, ref_multi, rtol=2e-3, atol=2e-3), (
        loss_multi, ref_multi)

    print("KERNEL_OK")
</pallas_src>

<mosaic_0001>
module attributes {stable_mosaic.version = 11 : i64} {
  func.func @_supcon_kernel(%arg0: i32, %arg1: i32, %arg2: memref<8x128xbf16, #tpu.memory_space<vmem>>, %arg3: memref<128x128xbf16, #tpu.memory_space<vmem>>, %arg4: memref<8x1xi32, #tpu.memory_space<vmem>>, %arg5: memref<1x128xi32, #tpu.memory_space<vmem>>, %arg6: memref<8x1xf32, #tpu.memory_space<vmem>>, %arg7: memref<8x1xf32, #tpu.memory_space<vmem>>, %arg8: memref<8x1xf32, #tpu.memory_space<vmem>>, %arg9: memref<8x1xf32, #tpu.memory_space<vmem>>, %arg10: memref<8x1xf32, #tpu.memory_space<vmem>>) attributes {dimension_semantics = [#tpu.dimension_semantics<parallel>, #tpu.dimension_semantics<arbitrary>], iteration_bounds = array<i64: 1, 1>, scalar_prefetch = 0 : i64, scratch_operands = 3 : i64, tpu.core_type = #tpu.core_type<tc>, window_params = [{transform_indices = @transform_0, window_bounds = array<i64: 8, 128>}, {transform_indices = @transform_1, window_bounds = array<i64: 128, 128>}, {transform_indices = @transform_2, window_bounds = array<i64: 8, 1>}, {transform_indices = @transform_3, window_bounds = array<i64: 1, 128>}, {transform_indices = @transform_4, window_bounds = array<i64: 8, 1>}, {transform_indices = @transform_5, window_bounds = array<i64: 8, 1>}]} {
    %c0_i32 = arith.constant 0 : i32
    %0 = arith.cmpi eq, %arg1, %c0_i32 : i32
    %1 = arith.extui %0 : i1 to i32
    %c0_i32_0 = arith.constant 0 : i32
    %2 = arith.cmpi ne, %1, %c0_i32_0 : i32
    scf.if %2 {
      %cst_16 = arith.constant 0xFF800000 : f32
      %30 = vector.broadcast %cst_16 : f32 to vector<8x1xf32>
      %c0_17 = arith.constant 0 : index
      %c0_18 = arith.constant 0 : index
      %31 = vector.load %arg8[%c0_17, %c0_18] : memref<8x1xf32, #tpu.memory_space<vmem>>, vector<8x1xf32>
      tpu.vector_store %arg8[%c0_17, %c0_18], %30 {strides = array<i32>} : memref<8x1xf32, #tpu.memory_space<vmem>>, vector<8x1xf32>,
      %cst_19 = arith.constant 0.000000e+00 : f32
      %32 = vector.broadcast %cst_19 : f32 to vector<8x1xf32>
      %c0_20 = arith.constant 0 : index
      %c0_21 = arith.constant 0 : index
      %33 = vector.load %arg9[%c0_20, %c0_21] : memref<8x1xf32, #tpu.memory_space<vmem>>, vector<8x1xf32>
      tpu.vector_store %arg9[%c0_20, %c0_21], %32 {strides = array<i32>} : memref<8x1xf32, #tpu.memory_space<vmem>>, vector<8x1xf32>,
      %cst_22 = arith.constant 0.000000e+00 : f32
      %34 = vector.broadcast %cst_22 : f32 to vector<8x1xf32>
      %c0_23 = arith.constant 0 : index
      %c0_24 = arith.constant 0 : index
      %35 = vector.load %arg10[%c0_23, %c0_24] : memref<8x1xf32, #tpu.memory_space<vmem>>, vector<8x1xf32>
      tpu.vector_store %arg10[%c0_23, %c0_24], %34 {strides = array<i32>} : memref<8x1xf32, #tpu.memory_space<vmem>>, vector<8x1xf32>,
    } else {
    }
    %c0 = arith.constant 0 : index
    %c0_1 = arith.constant 0 : index
    %3 = vector.load %arg2[%c0, %c0_1] : memref<8x128xbf16, #tpu.memory_space<vmem>>, vector<8x128xbf16>
    %c0_2 = arith.constant 0 : index
    %c0_3 = arith.constant 0 : index
    %4 = vector.load %arg3[%c0_2, %c0_3] : memref<128x128xbf16, #tpu.memory_space<vmem>>, vector<128x128xbf16>
    %cst = arith.constant dense<0.000000e+00> : vector<8x128xf32>
    %5 = tpu.matmul %3, %4, %cst {dimension_numbers = #tpu.dot_dimension_numbers<[1], [1], [0], [0], [0, 0, 1, 0], [], []>} : vector<8x128xbf16>, vector<128x128xbf16>, vector<8x128xf32> -> vector<8x128xf32>
    %c0_4 = arith.constant 0 : index
    %c0_5 = arith.constant 0 : index
    %6 = vector.load %arg4[%c0_4, %c0_5] : memref<8x1xi32, #tpu.memory_space<vmem>>, vector<8x1xi32>
    %c0_6 = arith.constant 0 : index
    %c0_7 = arith.constant 0 : index
    %7 = vector.load %arg5[%c0_6, %c0_7] : memref<1x128xi32, #tpu.memory_space<vmem>>, vector<1x128xi32>
    %8 = vector.broadcast %6 : vector<8x1xi32> to vector<8x128xi32>
    %9 = vector.broadcast %7 : vector<1x128xi32> to vector<8x128xi32>
    %10 = arith.cmpi eq, %8, %9 : vector<8x128xi32>
    %cst_8 = arith.constant 0.000000e+00 : f32
    %11 = vector.broadcast %cst_8 : f32 to vector<8x128xf32>
    %12 = arith.select %10, %5, %11 : vector<8x128xi1>, vector<8x128xf32>
    %c8_i32 = arith.constant 8 : i32
    %13 = arith.muli %arg0, %c8_i32 : i32
    %c128_i32 = arith.constant 128 : i32
    %14 = arith.muli %arg1, %c128_i32 : i32
    %c128_i32_9 = arith.constant 128 : i32
    %15 = arith.addi %14, %c128_i32_9 : i32
    %16 = arith.cmpi slt, %13, %15 : i32
    %c8_i32_10 = arith.constant 8 : i32
    %17 = arith.addi %13, %c8_i32_10 : i32
    %18 = arith.cmpi slt, %14, %17 : i32
    %19 = arith.andi %16, %18 : i1
    %c0_i32_11 = arith.constant 0 : i32
    %20 = arith.cmpi eq, %arg1, %c0_i32_11 : i32
    %21 = arith.ori %19, %20 : i1
    %22 = arith.extui %21 : i1 to i32
    %c0_i32_12 = arith.constant 0 : i32
    %23 = arith.cmpi ne, %22, %c0_i32_12 : i32
    scf.if %23 {
      %30 = tpu.iota {dimensions = array<i32: 0>} : vector<8x128xi32>
      %31 = arith.subi %13, %14 : i32
      %32 = vector.broadcast %31 : i32 to vector<8x128xi32>
      %33 = arith.addi %30, %32 : vector<8x128xi32>
      %34 = tpu.iota {dimensions = array<i32: 1>} : vector<8x128xi32>
      %35 = arith.cmpi ne, %33, %34 : vector<8x128xi32>
      %36 = vector.broadcast %14 : i32 to vector<8x128xi32>
      %37 = arith.addi %34, %36 : vector<8x128xi32>
      %c8_i32_16 = arith.constant 8 : i32
      %38 = vector.broadcast %c8_i32_16 : i32 to vector<8x128xi32>
      %39 = arith.cmpi slt, %37, %38 : vector<8x128xi32>
      %40 = arith.andi %35, %39 : vector<8x128xi1>
      %cst_17 = arith.constant -1.000000e+30 : f32
      %41 = vector.broadcast %cst_17 : f32 to vector<8x128xf32>
      %42 = arith.select %40, %5, %41 : vector<8x128xi1>, vector<8x128xf32>
      %cst_18 = arith.constant 0.000000e+00 : f32
      %43 = vector.broadcast %cst_18 : f32 to vector<8x128xf32>
      %44 = arith.select %35, %12, %43 : vector<8x128xi1>, vector<8x128xf32>
      %c0_19 = arith.constant 0 : index
      %c0_20 = arith.constant 0 : index
      %45 = vector.load %arg8[%c0_19, %c0_20] : memref<8x1xf32, #tpu.memory_space<vmem>>, vector<8x1xf32>
      %cst_21 = arith.constant dense<0xFF800000> : vector<8xf32>
      %46 = vector.multi_reduction <maximumf>, %42, %cst_21 [1] : vector<8x128xf32> to vector<8xf32>
      %47 = vector.shape_cast %46 : vector<8xf32> to vector<8x1xf32>
      %48 = arith.maximumf %45, %47 : vector<8x1xf32>
      %49 = arith.subf %45, %48 : vector<8x1xf32>
      %50 = math.exp %49 : vector<8x1xf32>
      %51 = vector.broadcast %48 : vector<8x1xf32> to vector<8x128xf32>
      %52 = arith.subf %42, %51 : vector<8x128xf32>
      %53 = math.exp %52 : vector<8x128xf32>
      %c0_22 = arith.constant 0 : index
      %c0_23 = arith.constant 0 : index
      %54 = vector.load %arg9[%c0_22, %c0_23] : memref<8x1xf32, #tpu.memory_space<vmem>>, vector<8x1xf32>
      %55 = arith.mulf %54, %50 : vector<8x1xf32>
      %cst_24 = arith.constant dense<0.000000e+00> : vector<8xf32>
      %56 = vector.multi_reduction <add>, %53, %cst_24 [1] : vector<8x128xf32> to vector<8xf32>
      %57 = vector.shape_cast %56 : vector<8xf32> to vector<8x1xf32>
      %58 = arith.addf %55, %57 : vector<8x1xf32>
      %c0_25 = arith.constant 0 : index
      %c0_26 = arith.constant 0 : index
      %59 = vector.load %arg9[%c0_25, %c0_26] : memref<8x1xf32, #tpu.memory_space<vmem>>, vector<8x1xf32>
      tpu.vector_store %arg9[%c0_25, %c0_26], %58 {strides = array<i32>} : memref<8x1xf32, #tpu.memory_space<vmem>>, vector<8x1xf32>,
      %c0_27 = arith.constant 0 : index
      %c0_28 = arith.constant 0 : index
      %60 = vector.load %arg10[%c0_27, %c0_28] : memref<8x1xf32, #tpu.memory_space<vmem>>, vector<8x1xf32>
      %cst_29 = arith.constant dense<0.000000e+00> : vector<8xf32>
      %61 = vector.multi_reduction <add>, %44, %cst_29 [1] : vector<8x128xf32> to vector<8xf32>
      %62 = vector.shape_cast %61 : vector<8xf32> to vector<8x1xf32>
      %63 = arith.addf %60, %62 : vector<8x1xf32>
      %c0_30 = arith.constant 0 : index
      %c0_31 = arith.constant 0 : index
      %64 = vector.load %arg10[%c0_30, %c0_31] : memref<8x1xf32, #tpu.memory_space<vmem>>, vector<8x1xf32>
      tpu.vector_store %arg10[%c0_30, %c0_31], %63 {strides = array<i32>} : memref<8x1xf32, #tpu.memory_space<vmem>>, vector<8x1xf32>,
      %c0_32 = arith.constant 0 : index
      %c0_33 = arith.constant 0 : index
      %65 = vector.load %arg8[%c0_32, %c0_33] : memref<8x1xf32, #tpu.memory_space<vmem>>, vector<8x1xf32>
      tpu.vector_store %arg8[%c0_32, %c0_33], %48 {strides = array<i32>} : memref<8x1xf32, #tpu.memory_space<vmem>>, vector<8x1xf32>,
    } else {
    }
    %true = arith.constant true
    %24 = arith.xori %21, %true : i1
    %25 = arith.extui %24 : i1 to i32
    %c0_i32_13 = arith.constant 0 : i32
    %26 = arith.cmpi ne, %25, %c0_i32_13 : i32
    scf.if %26 {
      %c0_16 = arith.constant 0 : index
      %c0_17 = arith.constant 0 : index
      %30 = vector.load %arg8[%c0_16, %c0_17] : memref<8x1xf32, #tpu.memory_space<vmem>>, vector<8x1xf32>
      %cst_18 = arith.constant dense<0xFF800000> : vector<8xf32>
      %31 = vector.multi_reduction <maximumf>, %5, %cst_18 [1] : vector<8x128xf32> to vector<8xf32>
      %32 = vector.shape_cast %31 : vector<8xf32> to vector<8x1xf32>
      %33 = arith.maximumf %30, %32 : vector<8x1xf32>
      %34 = arith.subf %30, %33 : vector<8x1xf32>
      %35 = math.exp %34 : vector<8x1xf32>
      %36 = vector.broadcast %33 : vector<8x1xf32> to vector<8x128xf32>
      %37 = arith.subf %5, %36 : vector<8x128xf32>
      %38 = math.exp %37 : vector<8x128xf32>
      %c0_19 = arith.constant 0 : index
      %c0_20 = arith.constant 0 : index
      %39 = vector.load %arg9[%c0_19, %c0_20] : memref<8x1xf32, #tpu.memory_space<vmem>>, vector<8x1xf32>
      %40 = arith.mulf %39, %35 : vector<8x1xf32>
      %cst_21 = arith.constant dense<0.000000e+00> : vector<8xf32>
      %41 = vector.multi_reduction <add>, %38, %cst_21 [1] : vector<8x128xf32> to vector<8xf32>
      %42 = vector.shape_cast %41 : vector<8xf32> to vector<8x1xf32>
      %43 = arith.addf %40, %42 : vector<8x1xf32>
      %c0_22 = arith.constant 0 : index
      %c0_23 = arith.constant 0 : index
      %44 = vector.load %arg9[%c0_22, %c0_23] : memref<8x1xf32, #tpu.memory_space<vmem>>, vector<8x1xf32>
      tpu.vector_store %arg9[%c0_22, %c0_23], %43 {strides = array<i32>} : memref<8x1xf32, #tpu.memory_space<vmem>>, vector<8x1xf32>,
      %c0_24 = arith.constant 0 : index
      %c0_25 = arith.constant 0 : index
      %45 = vector.load %arg10[%c0_24, %c0_25] : memref<8x1xf32, #tpu.memory_space<vmem>>, vector<8x1xf32>
      %cst_26 = arith.constant dense<0.000000e+00> : vector<8xf32>
      %46 = vector.multi_reduction <add>, %12, %cst_26 [1] : vector<8x128xf32> to vector<8xf32>
      %47 = vector.shape_cast %46 : vector<8xf32> to vector<8x1xf32>
      %48 = arith.addf %45, %47 : vector<8x1xf32>
      %c0_27 = arith.constant 0 : index
      %c0_28 = arith.constant 0 : index
      %49 = vector.load %arg10[%c0_27, %c0_28] : memref<8x1xf32, #tpu.memory_space<vmem>>, vector<8x1xf32>
      tpu.vector_store %arg10[%c0_27, %c0_28], %48 {strides = array<i32>} : memref<8x1xf32, #tpu.memory_space<vmem>>, vector<8x1xf32>,
      %c0_29 = arith.constant 0 : index
      %c0_30 = arith.constant 0 : index
      %50 = vector.load %arg8[%c0_29, %c0_30] : memref<8x1xf32, #tpu.memory_space<vmem>>, vector<8x1xf32>
      tpu.vector_store %arg8[%c0_29, %c0_30], %33 {strides = array<i32>} : memref<8x1xf32, #tpu.memory_space<vmem>>, vector<8x1xf32>,
    } else {
    }
    %c0_i32_14 = arith.constant 0 : i32
    %27 = arith.cmpi eq, %arg1, %c0_i32_14 : i32
    %28 = arith.extui %27 : i1 to i32
    %c0_i32_15 = arith.constant 0 : i32
    %29 = arith.cmpi ne, %28, %c0_i32_15 : i32
    scf.if %29 {
      %c0_16 = arith.constant 0 : index
      %c0_17 = arith.constant 0 : index
      %30 = vector.load %arg10[%c0_16, %c0_17] : memref<8x1xf32, #tpu.memory_space<vmem>>, vector<8x1xf32>
      %c0_18 = arith.constant 0 : index
      %c0_19 = arith.constant 0 : index
      %31 = vector.load %arg6[%c0_18, %c0_19] : memref<8x1xf32, #tpu.memory_space<vmem>>, vector<8x1xf32>
      %32 = arith.divf %30, %31 : vector<8x1xf32>
      %c0_20 = arith.constant 0 : index
      %c0_21 = arith.constant 0 : index
      %33 = vector.load %arg8[%c0_20, %c0_21] : memref<8x1xf32, #tpu.memory_space<vmem>>, vector<8x1xf32>
      %34 = arith.subf %32, %33 : vector<8x1xf32>
      %c0_22 = arith.constant 0 : index
      %c0_23 = arith.constant 0 : index
      %35 = vector.load %arg9[%c0_22, %c0_23] : memref<8x1xf32, #tpu.memory_space<vmem>>, vector<8x1xf32>
      %36 = math.log %35 : vector<8x1xf32>
      %37 = arith.subf %34, %36 : vector<8x1xf32>
      %cst_24 = arith.constant -1.000000e+00 : f32
      %38 = vector.broadcast %cst_24 : f32 to vector<8x1xf32>
      %39 = arith.mulf %38, %37 : vector<8x1xf32>
      %c0_25 = arith.constant 0 : index
      %c0_26 = arith.constant 0 : index
      %40 = vector.load %arg7[%c0_25, %c0_26] : memref<8x1xf32, #tpu.memory_space<vmem>>, vector<8x1xf32>
      tpu.vector_store %arg7[%c0_25, %c0_26], %39 {strides = array<i32>} : memref<8x1xf32, #tpu.memory_space<vmem>>, vector<8x1xf32>,
    } else {
    }
    return
  }
  func.func @transform_0(%arg0: i32, %arg1: i32) -> (i32, i32) {
    %c0_i32 = arith.constant 0 : i32
    %c0_i32_0 = arith.constant 0 : i32
    return %arg0, %c0_i32 : i32, i32
  }
  func.func @transform_1(%arg0: i32, %arg1: i32) -> (i32, i32) {
    %c0_i32 = arith.constant 0 : i32
    %c0_i32_0 = arith.constant 0 : i32
    return %arg1, %c0_i32 : i32, i32
  }
  func.func @transform_2(%arg0: i32, %arg1: i32) -> (i32, i32) {
    %c0_i32 = arith.constant 0 : i32
    %c0_i32_0 = arith.constant 0 : i32
    return %arg0, %c0_i32 : i32, i32
  }
  func.func @transform_3(%arg0: i32, %arg1: i32) -> (i32, i32) {
    %c0_i32 = arith.constant 0 : i32
    %c0_i32_0 = arith.constant 0 : i32
    return %c0_i32, %arg1 : i32, i32
  }
  func.func @transform_4(%arg0: i32, %arg1: i32) -> (i32, i32) {
    %c0_i32 = arith.constant 0 : i32
    %c0_i32_0 = arith.constant 0 : i32
    return %arg0, %c0_i32 : i32, i32
  }
  func.func @transform_5(%arg0: i32, %arg1: i32) -> (i32, i32) {
    %c0_i32 = arith.constant 0 : i32
    %c0_i32_0 = arith.constant 0 : i32
    return %arg0, %c0_i32 : i32, i32
  }
}

</mosaic_0001>

<bundles_post_ra>
// kernel: tpu_custom_call.1
= control target key start
LH: loop header
LB: loop body
LE: loop exit
PB: predicated region body
PF: predicated region fallthrough
CT: control target
= control target key end

     0   :  { %10 = vsyncpa [#allocation6], 0  ;;  %s352_s18 = smov [#allocation5]   ;;  %s425_s0 = inlined_call_operand.vmem [shape: bf16[8,128], index: 0, kind: input, shape index: {}]   ;;  %s426_s1 = inlined_call_operand.hbm [shape: bf16[128,128], index: 1, kind: input, shape index: {}]   ;;  %s427_s2 = inlined_call_operand.vmem [shape: s32[8,1], index: 2, kind: input, shape index: {}]   ;;  %s428_s3 = inlined_call_operand.vmem [shape: s32[1,128], index: 3, kind: input, shape index: {}]   ;;  %s429_s4 = inlined_call_operand.vmem [shape: f32[8,1], index: 4, kind: input, shape index: {}]   ;;  %s430_s5 = inlined_call_operand.vmem [shape: f32[8,1], index: 5, kind: output, shape index: {}]  }
   0x1   :  { %s18_s19 = sshll.u32 %s352_s18, 4  ;;  %s328_s22 = scalar_lea.hbm %s426_s1, 1024  ;;  %s19_s19 = int_to_ptr.vmem [resolvable:$true] %s18_s19 }
   0x2   :  { %p329_p0 = scmp.ne.s32.totalorder %s426_s1, %s328_s22  ;;  %p332_p1 = scmp.lt.u32.totalorder %s328_s22, %s426_s1 }
   0x4   :  { %p334_p2 = pnand %p332_p1, %p329_p0 }
   0x6   :  { %337 = shalt.err (!%p334_p2)
}
   0x7   :  { %s338_s27 = scalar_lea.vmem %s19_s19, 1024  ;;  %p343_p4 = scmp.lt.s32.totalorder %s19_s19, %s19_s19 }
   0x8   :  { %p339_p3 = scmp.ne.s32.totalorder %s19_s19, %s338_s27  ;;  %p344_p5 = scmp.lt.s32.totalorder %s338_s27, %s338_s27 }
   0xa   :  { %p345_p6 = por %p344_p5, %p343_p4 }
   0xc   :  { %p346_p7 = pnand %p345_p6, %p339_p3 }
   0xe   :  { %349 = shalt.err (!%p346_p7)
}
   0xf   :  { %s353_s28 = smov 64   ;;  %s354_s29 = smov 4  }
  0x10   :  { %24 = dma.hbm_to_vmem [thread:$0]  %s426_s1, 1024, %s19_s19, [#allocation6], %s353_s28, %s353_s28, %s354_s29  }
  0x11   :  { %350 = dma.done.wait [#allocation6], 1024  }
  0x12   :  { %351 = vsyncadd [#allocation6], 4294966272  ;;  %v355_v0 = vmov 0.0   ;;  %vm356_vm0 = vmmov 0   ;;  %v357_v1 = vmov 0   ;;  %v312_v2 = vld [vmem:[#allocation5] sm:$0xff]   ;;  %v171_v13 = vlaneseq }
  0x13   :  { %283 = vmatprep.subr.bf16.mxu0 %v355_v0  ;;  %299 = vmatprep.mubr.msk.bf16.mxu0 %vm356_vm0, %v355_v0  ;;  %v313_v3 = vld [vmem:[#allocation5 + $0x8] sm:$0xff]   ;;  %v314_v5 = vld [vmem:[#allocation5 + $0x10] sm:$0xff]   ;;  %v315_v6 = vld [vmem:[#allocation5 + $0x18] sm:$0xff]   ;;  %vm39_vm1 = vcmask 7168   ;;  %v358_v12 = vmov -inf  }
  0x14   :  { %311 = vset.pattern.permute.xlu1 %v357_v1  ;;  %310 = vset.pattern.permute.xlu0 %v357_v1  ;;  %v148_v4 = vld [vmem:[%s427_s2] sm:$0xff]  ;;  %v316_v7 = vld [vmem:[#allocation5 + $0x20] sm:$0xff]   ;;  %v318_v9 = vld [vmem:[#allocation5 + $0x30] sm:$0xff]   ;;  %40 = vst.msk [vmem:[#allocation2] sm:$0xff] %vm39_vm1, %v358_v12  ;;  %v172_v14 = vshrl.u32 %v171_v13, 7  ;;  %v177_v15 = vand.u32 127, %v171_v13 }
  0x15   :  { %284 = vmatpush3.bf16.xpose.msra.mxu0 %v312_v2  ;;  %151 = vperm.xlu1 %311, %v148_v4   ;;  %v317_v8 = vld [vmem:[#allocation5 + $0x28] sm:$0xff]   ;;  %v319_v10 = vld [vmem:[#allocation5 + $0x38] sm:$0xff]   ;;  %41 = vst.msk [vmem:[#allocation3] sm:$0xff] %vm39_vm1, %v355_v0  ;;  %42 = vst.msk [vmem:[#allocation4] sm:$0xff] %vm39_vm1, %v355_v0 }
  0x16   :  { %285 = vmatprep.subr.bf16.mxu0 %v355_v0  ;;  %v43_v11 = vld [vmem:[%s425_s0] sm:$0xf]  ;;  %vm178_vm2 = vcmp.ne.s32.totalorder %v172_v14, %v177_v15  ;;  %vm181_vm3 = vcmp.lt.s32.totalorder %v177_v15, 8 }
  0x17   :  { %vm182_vm4 = vmand %vm178_vm2, %vm181_vm3  ;;  %v273_v28 = vld [vmem:[%s428_s3] ss:$0 sm:$0xff] }
  0x18   :  { %v248_v40 = vld [vmem:[%s429_s4] sm:$0xff] }
  0x1b   :  { %v185_v21 = vld [vmem:[#allocation2] sm:$0xff] }
  0x1c   :  { %v200_v35 = vld [vmem:[#allocation3] sm:$0xff]  ;;  %v207_v39 = vld [vmem:[#allocation4] sm:$0xff] }
  0x1d   :  { %286 = vmatpush3.bf16.xpose.msra.mxu0 %v313_v3 }
  0x1e   :  { %287 = vmatprep.subr.bf16.mxu0 %v355_v0 }
  0x25   :  { %288 = vmatpush3.bf16.xpose.msra.mxu0 %v314_v5 }
  0x26   :  { %289 = vmatprep.subr.bf16.mxu0 %v355_v0 }
  0x2d   :  { %290 = vmatpush3.bf16.xpose.msra.mxu0 %v315_v6 }
  0x2e   :  { %291 = vmatprep.subr.bf16.mxu0 %v355_v0 }
  0x35   :  { %292 = vmatpush3.bf16.xpose.msra.mxu0 %v316_v7 }
  0x36   :  { %293 = vmatprep.subr.bf16.mxu0 %v355_v0 }
  0x3d   :  { %294 = vmatpush3.bf16.xpose.msra.mxu0 %v317_v8 }
  0x3e   :  { %295 = vmatprep.subr.bf16.mxu0 %v355_v0 }
  0x45   :  { %296 = vmatpush3.bf16.xpose.msra.mxu0 %v318_v9 }
  0x46   :  { %297 = vmatprep.subr.bf16.mxu0 %v355_v0 }
  0x4d   :  { %298 = vmatpush3.bf16.xpose.msra.mxu0 %v319_v10 }
  0x54   :  { %300 = vmatmul.mubr.bf16.vlgmr.msra.gmra.mrb[0].mxu0 %v43_v11 }
  0x94   :  { %v152_v29 = vpop.permute.xlu1 %151 }
  0x95   :  { %vm157_vm5 = vcmp.eq.s32.totalorder %v152_v29, %v273_v28 }
 0x127   :  { %v142_v16 = vpop.f32.mrb[0].mxu0 }
 0x128   :  { %v301_v17 = vpop.f32.mrb[1].mxu0  ;;  %v183_v18 = vsel %vm182_vm4, %v142_v16, -1e+30  ;;  %v158_v31 = vsel %vm157_vm5, %v142_v16, 0.0 }
 0x129   :  { %186 = vmax.xlane.f32.xlu0 %v183_v18  ;;  %v145_v19 = vpop.f32.mrb[2].mxu0  ;;  %v184_v32 = vsel %vm178_vm2, %v158_v31, 0.0 }
 0x12a   :  { %v302_v20 = vpop.f32.mrb[3].mxu0 }
 0x1b6   :  { %v187_v22 = vpop.xlane.xlu0 %186 }
 0x1b7   :  { %v188_v23 = vmax.f32 %v185_v21, %v187_v22 }
 0x1b9   :  { %v189_v24 = vsub.f32 %v185_v21, %v188_v23  ;;  %212 = vst.msk [vmem:[#allocation2] sm:$0xff] %vm39_vm1, %v188_v23  ;;  %194 = vperm.xlu0 %310, %v188_v23  }
 0x1bb   :  { %v190_v33 = vmul.f32 1.442695, %v189_v24 }
 0x1c0   :  { %v251_v48 = vld [vmem:[#allocation2] sm:$0xff] }
 0x238   :  { %v195_v25 = vpop.permute.xlu0 %194 }
 0x239   :  { %v197_v26 = vsub.f32 %v183_v18, %v195_v25 }
 0x23b   :  { %v198_v27 = vmul.f32 1.442695, %v197_v26 }
 0x23d   :  { %320 = vpow2.f32 %v198_v27 }
 0x23e   :  { %322 = vpow2.f32 %v190_v33 }
 0x23f   :  { %324 = vrcp.f32 %v248_v40 }
 0x247   :  { %v321_v30 = vpop.eup %320 }
 0x248   :  { %202 = vadd.xlane.f32.xlu1 %v321_v30  ;;  %v323_v34 = vpop.eup %322 }
 0x249   :  { %v201_v36 = vmul.f32 %v323_v34, %v200_v35  ;;  %v325_v44 = vpop.eup %324 }
 0x24c   :  { %208 = vadd.xlane.f32.xlu1 %v184_v32 }
 0x2d5   :  { %v203_v37 = vpop.xlane.xlu1 %202 }
 0x2d6   :  { %v204_v38 = vadd.f32 %v203_v37, %v201_v36 }
 0x2d8   :  { %206 = vst.msk [vmem:[#allocation3] sm:$0xff] %vm39_vm1, %v204_v38 }
 0x2d9   :  { %v209_v41 = vpop.xlane.xlu1 %208 }
 0x2da   :  { %v210_v42 = vadd.f32 %v209_v41, %v207_v39 }
 0x2dc   :  { %211 = vst.msk [vmem:[#allocation4] sm:$0xff] %vm39_vm1, %v210_v42 }
 0x2df   :  { %v253_v43 = vld [vmem:[#allocation3] sm:$0xff] }
 0x2e0   :  { %326 = vlog2.f32 %v253_v43 }
 0x2e3   :  { %v247_v45 = vld [vmem:[#allocation4] sm:$0xff] }
 0x2e4   :  { %v250_v46 = vmul.f32 %v325_v44, %v247_v45 }
 0x2e6   :  { %v252_v50 = vsub.f32 %v250_v46, %v251_v48 }
 0x2ea   :  { %v327_v47 = vpop.eup %326 }
 0x2eb   :  { %v255_v49 = vmul.f32 0.6931472, %v327_v47 }
 0x2ed   :  { %v256_v51 = vsub.f32 %v252_v50, %v255_v49 }
 0x2ef   :  { %v257_v52 = vmul.f32 -1.0, %v256_v51 }
 0x2f1   :  { %259 = vst.msk [vmem:[%s430_s5] sm:$0xff] %vm39_vm1, %v257_v52 }
 0x2f2   :  { %264 = vsyncpa [#allocation6], 1 }

</bundles_post_ra>
